<compile_context>
chip_gen: v6e
topology: v6e:2x2x1
jax: 0.10.0
libtpu: 0.0.40
codegen_flags: <defaults>
</compile_context>

<pallas_src>
import functools

import jax
import jax.numpy as jnp
from jax.experimental import pallas as pl
from jax.experimental.pallas import tpu as pltpu

HIDDEN = 64   # trunk width in the PyTorch module
LANES = 128   # padded lane width used inside the kernel


def dueling_dqn_kernel(x_ref, w_ref, b_ref, out_ref, *, d_pad):
    """One batch tile of the fused DuelingDQN forward.

    x_ref  : (TB, d_pad)           input tile (1/5 scale folded into w1)
    w_ref  : (d_pad + 256, 128)    [w1_scaled ; w2_fused ; w3_dueling_folded]
    b_ref  : (3, 128)              [b1 ; b2_fused ; b3_dueling_folded]
    out_ref: (TB, 128)             cols [0, n_actions) hold the Q-values
    """
    x = x_ref[...]

    # Trunk: Linear(D, 64) + ReLU (x/5 folded into w1; cols 64:128 stay 0).
    h = jnp.dot(x, w_ref[0:d_pad, :], preferred_element_type=jnp.float32)
    h = jnp.maximum(h + b_ref[0:1, :], 0.0)

    # Fused heads stage 1: [ha | hv | 0] = ReLU(h @ [w2a | w2v | 0] + [b2a | b2v | 0])
    h2 = jnp.dot(h, w_ref[d_pad:d_pad + LANES, :],
                 preferred_element_type=jnp.float32)
    h2 = jnp.maximum(h2 + b_ref[1:2, :], 0.0)

    # Fused heads stage 2 with the dueling aggregation pre-folded into the
    # weights/bias:  out = val + (adv - mean(adv))  ==  h2 @ W3' + b3'.
    y = jnp.dot(h2, w_ref[d_pad + LANES:d_pad + 2 * LANES, :],
                preferred_element_type=jnp.float32)
    out_ref[...] = (y + b_ref[2:3, :]).astype(out_ref.dtype)


def init_params(key, input_dim, n_actions):
    """Deterministic init mimicking nn.Linear (weights stored transposed: (in, out))."""
    ks = jax.random.split(key, 10)

    def linear(kw, kb, fan_in, fan_out):
        bound = 1.0 / jnp.sqrt(jnp.float32(fan_in))
        w = jax.random.uniform(kw, (fan_in, fan_out), jnp.float32, -bound, bound)
        b = jax.random.uniform(kb, (1, fan_out), jnp.float32, -bound, bound)
        return w, b

    w1, b1 = linear(ks[0], ks[1], input_dim, HIDDEN)
    w2a, b2a = linear(ks[2], ks[3], HIDDEN, 32)
    w3a, b3a = linear(ks[4], ks[5], 32, n_actions)
    w2v, b2v = linear(ks[6], ks[7], HIDDEN, 32)
    w3v, b3v = linear(ks[8], ks[9], 32, 1)
    return dict(w1=w1, b1=b1, w2a=w2a, b2a=b2a, w3a=w3a, b3a=b3a,
                w2v=w2v, b2v=b2v, w3v=w3v, b3v=b3v)


def pack_params(p, input_dim, n_actions):
    """One-time packing (do at init, not per call).

    Folds the x/5 scale into w1, fuses the adv/val heads, folds the dueling
    aggregation (mean-subtraction + val broadcast) into the final matrix, and
    stacks everything into one 128-lane weight slab + one bias slab.
    """
    d_pad = ((input_dim + 7) // 8) * 8

    # Trunk weights with the 1/5 input scale folded in, padded to (d_pad, 128).
    w1 = jnp.zeros((d_pad, LANES), jnp.float32)
    w1 = w1.at[:input_dim, :HIDDEN].set(p["w1"] / 5.0)
    b1 = jnp.zeros((1, LANES), jnp.float32).at[:, :HIDDEN].set(p["b1"])

    # Fused head stage 1: cols 0:32 -> adv branch, cols 32:64 -> val branch.
    w2 = jnp.zeros((LANES, LANES), jnp.float32)
    w2 = w2.at[:HIDDEN, 0:32].set(p["w2a"])
    w2 = w2.at[:HIDDEN, 32:64].set(p["w2v"])
    b2 = jnp.zeros((1, LANES), jnp.float32)
    b2 = b2.at[:, 0:32].set(p["b2a"])
    b2 = b2.at[:, 32:64].set(p["b2v"])

    # Fused head stage 2 with the dueling aggregation folded in:
    #   out_j = ha @ (w3a[:,j] - rowmean(w3a)) + (b3a_j - mean(b3a))
    #         + hv @ w3v + b3v
    w3a_centered = p["w3a"] - jnp.mean(p["w3a"], axis=1, keepdims=True)   # (32, A)
    w3 = jnp.zeros((LANES, LANES), jnp.float32)
    w3 = w3.at[0:32, :n_actions].set(w3a_centered)
    w3 = w3.at[32:64, :n_actions].set(jnp.broadcast_to(p["w3v"], (32, n_actions)))
    b3 = jnp.zeros((1, LANES), jnp.float32)
    b3 = b3.at[:, :n_actions].set(p["b3a"] - jnp.mean(p["b3a"]) + p["b3v"])

    w_slab = jnp.concatenate([w1, w2, w3], axis=0)    # (d_pad + 256, 128)
    b_slab = jnp.concatenate([b1, b2, b3], axis=0)    # (3, 128)
    return w_slab, b_slab


def dueling_dqn_forward(x, w_slab, b_slab, n_actions):
    """x: (B, D). w_slab/b_slab: packed params from pack_params."""
    x = x.astype(jnp.float32)                       # == PyTorch x.float()
    B, D = x.shape
    d_pad = w_slab.shape[0] - 2 * LANES
    if D != d_pad:                                  # padded trunk rows carry zero weights
        x = jnp.pad(x, ((0, 0), (0, d_pad - D)))

    # Batch tiling: single tile for small batches; 512-row tiles (f32 sublane
    # aligned, well under scoped-VMEM limits on v5e/v6e/v7x) once batch grows.
    if B <= 512:
        tb, b_pad = B, B
    else:
        tb = 512
        b_pad = ((B + tb - 1) // tb) * tb
        if b_pad != B:
            x = jnp.pad(x, ((0, b_pad - B), (0, 0)))

    grid = (b_pad // tb,)
    kernel = functools.partial(dueling_dqn_kernel, d_pad=d_pad)

    flops = 2 * b_pad * (d_pad + 2 * LANES) * LANES
    bytes_accessed = 4 * (b_pad * d_pad + w_slab.size + b_slab.size + b_pad * LANES)

    out = pl.pallas_call(
        kernel,
        out_shape=jax.ShapeDtypeStruct((b_pad, LANES), jnp.float32),
        grid=grid,
        in_specs=[
            pl.BlockSpec((tb, d_pad), lambda i: (i, 0)),     # x tile, pipelined over batch
            pl.BlockSpec(w_slab.shape, lambda i: (0, 0)),    # weights resident across grid
            pl.BlockSpec(b_slab.shape, lambda i: (0, 0)),    # biases resident across grid
        ],
        out_specs=pl.BlockSpec((tb, LANES), lambda i: (i, 0)),  # lane-dense, unmasked stores
        compiler_params=pltpu.CompilerParams(
            dimension_semantics=("parallel",),               # v7x: shard batch over 2 TCs
        ),
        cost_estimate=pl.CostEstimate(
            flops=flops, transcendentals=0, bytes_accessed=bytes_accessed),
    )(x, w_slab, b_slab)
    return out[:B, :n_actions]
    # TODO(synk): for MXU-bound large-batch inference on v6e/v7x, store the packed slab
    # in bf16 (f32 accumulation) — skipped to keep tight agreement with the f32 reference.


def reference_forward(x, p):
    """Pure-JAX reference of the PyTorch forward (unfused, unscaled weights)."""
    fx = x.astype(jnp.float32) / 5.0
    h = jnp.maximum(fx @ p["w1"] + p["b1"], 0.0)
    ha = jnp.maximum(h @ p["w2a"] + p["b2a"], 0.0)
    adv = ha @ p["w3a"] + p["b3a"]
    hv = jnp.maximum(h @ p["w2v"] + p["b2v"], 0.0)
    val = hv @ p["w3v"] + p["b3v"]
    return val + (adv - adv.mean(axis=1, keepdims=True))


if __name__ == "__main__":
    key = jax.random.PRNGKey(0)
    k_x, k_p = jax.random.split(key)

    B, D, A = 8, 16, 4  # batch, input_shape[0], n_actions
    # Integer-ish DQN observations, cast to float (== x.float() in the reference).
    x = jax.random.randint(k_x, (B, D), -10, 10).astype(jnp.float32)
    params = init_params(k_p, D, A)
    w_slab, b_slab = pack_params(params, D, A)   # one-time packing, reused every step

    out = dueling_dqn_forward(x, w_slab, b_slab, n_actions=A)
    out = jax.block_until_ready(out)

    ref = reference_forward(x, params)
    assert out.shape == (B, A)
    # tolerance covers the (x/5)@w1 vs x@(w1/5) and mean-fold rounding-order differences
    assert jnp.allclose(out, ref, atol=1e-4, rtol=1e-4), "mismatch vs reference"

    print("KERNEL_OK")
</pallas_src>

<mosaic_0001>
module attributes {stable_mosaic.version = 11 : i64} {
  func.func @dueling_dqn_kernel(%arg0: i32, %arg1: memref<8x16xf32, #tpu.memory_space<vmem>>, %arg2: memref<272x128xf32, #tpu.memory_space<vmem>>, %arg3: memref<3x128xf32, #tpu.memory_space<vmem>>, %arg4: memref<8x128xf32, #tpu.memory_space<vmem>>) attributes {dimension_semantics = [#tpu.dimension_semantics<parallel>], iteration_bounds = array<i64: 1>, scalar_prefetch = 0 : i64, scratch_operands = 0 : i64, tpu.core_type = #tpu.core_type<tc>, window_params = [{transform_indices = @transform_0, window_bounds = array<i64: 8, 16>}, {pipeline_mode = #tpu.pipeline_mode<synchronous>, transform_indices = @transform_1, window_bounds = array<i64: 272, 128>}, {pipeline_mode = #tpu.pipeline_mode<synchronous>, transform_indices = @transform_2, window_bounds = array<i64: 3, 128>}, {transform_indices = @transform_3, window_bounds = array<i64: 8, 128>}]} {
    %c0 = arith.constant 0 : index
    %c0_0 = arith.constant 0 : index
    %0 = vector.load %arg1[%c0, %c0_0] : memref<8x16xf32, #tpu.memory_space<vmem>>, vector<8x16xf32>
    %c0_1 = arith.constant 0 : index
    %c0_2 = arith.constant 0 : index
    %1 = vector.load %arg2[%c0_1, %c0_2] : memref<272x128xf32, #tpu.memory_space<vmem>>, vector<16x128xf32>
    %cst = arith.constant dense<0.000000e+00> : vector<8x128xf32>
    %2 = tpu.matmul %0, %1, %cst {dimension_numbers = #tpu.dot_dimension_numbers<[1], [0], [0], [1], [0, 0, 1, 1], [], []>} : vector<8x16xf32>, vector<16x128xf32>, vector<8x128xf32> -> vector<8x128xf32>
    %c0_3 = arith.constant 0 : index
    %c0_4 = arith.constant 0 : index
    %3 = vector.load %arg3[%c0_3, %c0_4] : memref<3x128xf32, #tpu.memory_space<vmem>>, vector<1x128xf32>
    %4 = vector.broadcast %3 : vector<1x128xf32> to vector<8x128xf32>
    %5 = arith.addf %2, %4 : vector<8x128xf32>
    %cst_5 = arith.constant 0.000000e+00 : f32
    %6 = vector.broadcast %cst_5 : f32 to vector<8x128xf32>
    %7 = arith.maximumf %5, %6 : vector<8x128xf32>
    %c16 = arith.constant 16 : index
    %c0_6 = arith.constant 0 : index
    %8 = vector.load %arg2[%c16, %c0_6] : memref<272x128xf32, #tpu.memory_space<vmem>>, vector<128x128xf32>
    %cst_7 = arith.constant dense<0.000000e+00> : vector<8x128xf32>
    %9 = tpu.matmul %7, %8, %cst_7 {dimension_numbers = #tpu.dot_dimension_numbers<[1], [0], [0], [1], [0, 0, 1, 1], [], []>} : vector<8x128xf32>, vector<128x128xf32>, vector<8x128xf32> -> vector<8x128xf32>
    %c1 = arith.constant 1 : index
    %c0_8 = arith.constant 0 : index
    %10 = vector.load %arg3[%c1, %c0_8] : memref<3x128xf32, #tpu.memory_space<vmem>>, vector<1x128xf32>
    %11 = vector.broadcast %10 : vector<1x128xf32> to vector<8x128xf32>
    %12 = arith.addf %9, %11 : vector<8x128xf32>
    %cst_9 = arith.constant 0.000000e+00 : f32
    %13 = vector.broadcast %cst_9 : f32 to vector<8x128xf32>
    %14 = arith.maximumf %12, %13 : vector<8x128xf32>
    %c144 = arith.constant 144 : index
    %c0_10 = arith.constant 0 : index
    %15 = vector.load %arg2[%c144, %c0_10] : memref<272x128xf32, #tpu.memory_space<vmem>>, vector<128x128xf32>
    %cst_11 = arith.constant dense<0.000000e+00> : vector<8x128xf32>
    %16 = tpu.matmul %14, %15, %cst_11 {dimension_numbers = #tpu.dot_dimension_numbers<[1], [0], [0], [1], [0, 0, 1, 1], [], []>} : vector<8x128xf32>, vector<128x128xf32>, vector<8x128xf32> -> vector<8x128xf32>
    %c2 = arith.constant 2 : index
    %c0_12 = arith.constant 0 : index
    %17 = vector.load %arg3[%c2, %c0_12] : memref<3x128xf32, #tpu.memory_space<vmem>>, vector<1x128xf32>
    %18 = vector.broadcast %17 : vector<1x128xf32> to vector<8x128xf32>
    %19 = arith.addf %16, %18 : vector<8x128xf32>
    %c0_13 = arith.constant 0 : index
    %c0_14 = arith.constant 0 : index
    %20 = vector.load %arg4[%c0_13, %c0_14] : memref<8x128xf32, #tpu.memory_space<vmem>>, vector<8x128xf32>
    tpu.vector_store %arg4[%c0_13, %c0_14], %19 {strides = array<i32>} : memref<8x128xf32, #tpu.memory_space<vmem>>, vector<8x128xf32>,
    return
  }
  func.func @transform_0(%arg0: i32) -> (i32, i32) {
    %c0_i32 = arith.constant 0 : i32
    %c0_i32_0 = arith.constant 0 : i32
    return %arg0, %c0_i32 : i32, i32
  }
  func.func @transform_1(%arg0: i32) -> (i32, i32) {
    %c0_i32 = arith.constant 0 : i32
    %c0_i32_0 = arith.constant 0 : i32
    %c0_i32_1 = arith.constant 0 : i32
    return %c0_i32, %c0_i32_0 : i32, i32
  }
  func.func @transform_2(%arg0: i32) -> (i32, i32) {
    %c0_i32 = arith.constant 0 : i32
    %c0_i32_0 = arith.constant 0 : i32
    %c0_i32_1 = arith.constant 0 : i32
    return %c0_i32, %c0_i32_0 : i32, i32
  }
  func.func @transform_3(%arg0: i32) -> (i32, i32) {
    %c0_i32 = arith.constant 0 : i32
    %c0_i32_0 = arith.constant 0 : i32
    return %arg0, %c0_i32 : i32, i32
  }
}

</mosaic_0001>

<bundles_post_ra>
// kernel: tpu_custom_call.1
= control target key start
LH: loop header
LB: loop body
LE: loop exit
PB: predicated region body
PF: predicated region fallthrough
CT: control target
= control target key end

     0   :  { %8 = vsyncpa [#allocation3], 0  ;;  %s627_s0 = inlined_call_operand.hbm [shape: f32[8,16], index: 0, kind: input, shape index: {}]   ;;  %s628_s1 = inlined_call_operand.hbm [shape: f32[272,128], index: 1, kind: input, shape index: {}]   ;;  %s629_s2 = inlined_call_operand.hbm [shape: f32[3,128], index: 2, kind: input, shape index: {}]   ;;  %s630_s3 = inlined_call_operand.hbm [shape: f32[8,128], index: 3, kind: output, shape index: {}]  }
   0x1   :  { %9 = vsyncpa [#allocation6], 0 }
   0x2   :  { %10 = vsyncpa [#allocation4], 0  ;;  %s547_s12 = smov [#allocation5]  }
   0x3   :  { %s26_s13 = sshll.u32 %s547_s12, 4  ;;  %s27_s13 = int_to_ptr.vmem [resolvable:$true] %s26_s13 }
   0x4   :  { %s469_s14 = scalar_lea.vmem %s27_s13, 4352  ;;  %p474_p1 = scmp.lt.s32.totalorder %s27_s13, %s27_s13 }
   0x5   :  { %p470_p0 = scmp.ne.s32.totalorder %s27_s13, %s469_s14  ;;  %p475_p2 = scmp.lt.s32.totalorder %s469_s14, %s469_s14 }
   0x7   :  { %p476_p3 = por %p475_p2, %p474_p1 }
   0x9   :  { %p477_p4 = pnand %p476_p3, %p470_p0 }
   0xb   :  { %480 = shalt.err (!%p477_p4)
}
   0xc   :  { %s548_s15 = smov 128   ;;  %s549_s16 = smov 8  }
   0xd   :  { %32 = dma.hbm_to_vmem [thread:$0]  %s628_s1, 4352, %s27_s13, [#allocation6], %s548_s15, %s548_s15, %s549_s16  }
   0xe   :  { %s550_s19 = smov [#allocation2]   ;;  %s551_s21 = smov [#allocation7]  }
   0xf   :  { %s17_s20 = sshll.u32 %s550_s19, 4  ;;  %s39_s22 = sshll.u32 %s551_s21, 4  ;;  %s18_s20 = int_to_ptr.vmem [resolvable:$true] %s17_s20  ;;  %s40_s22 = int_to_ptr.vmem [resolvable:$true] %s39_s22 }
  0x10   :  { %s489_s23 = scalar_lea.vmem %s18_s20, 128  ;;  %p494_p6 = scmp.lt.s32.totalorder %s18_s20, %s18_s20 }
  0x11   :  { %p490_p5 = scmp.ne.s32.totalorder %s18_s20, %s489_s23  ;;  %p495_p7 = scmp.lt.s32.totalorder %s489_s23, %s489_s23 }
  0x13   :  { %p496_p8 = por %p495_p7, %p494_p6 }
  0x15   :  { %p497_p9 = pnand %p496_p8, %p490_p5 }
  0x17   :  { %500 = shalt.err (!%p497_p9)
}
  0x18   :  { %20 = dma.hbm_to_vmem [thread:$0]  %s627_s0, 128, %s18_s20, [#allocation3]  }
  0x19   :  { %s509_s26 = scalar_lea.vmem %s40_s22, 64  ;;  %p514_p11 = scmp.lt.s32.totalorder %s40_s22, %s40_s22 }
  0x1a   :  { %p510_p10 = scmp.ne.s32.totalorder %s40_s22, %s509_s26  ;;  %p515_p12 = scmp.lt.s32.totalorder %s509_s26, %s509_s26 }
  0x1c   :  { %p516_p13 = por %p515_p12, %p514_p11 }
  0x1e   :  { %p517_p0 = pnand %p516_p13, %p510_p10 }
  0x20   :  { %520 = shalt.err (!%p517_p0)
}
  0x21   :  { %42 = dma.hbm_to_vmem [thread:$0]  %s629_s2, 64, %s40_s22, [#allocation6]  }
  0x22   :  { %541 = dma.done.wait [#allocation3], 128  }
  0x23   :  { %542 = vsyncadd [#allocation3], 4294967168 }
  0x24   :  { %543 = dma.done.wait [#allocation6], 4416  }
  0x25   :  { %544 = vsyncadd [#allocation6], 4294962880  ;;  %v552_v0 = vmov 0.0   ;;  %vm553_vm0 = vmmov 0   ;;  %v54_v1 = vld [vmem:[#allocation5 + $0x8] sm:$0xff]  ;;  %v53_v2 = vld [vmem:[#allocation5] sm:$0xff] }
  0x26   :  { %376 = vmatprep.subr.mxu0 %v552_v0  ;;  %380 = vmatprep.mubr.msk.f32.mxu0 %vm553_vm0, %v552_v0  ;;  %v52_v3 = vld [vmem:[#allocation2] sm:$0xff]  ;;  %vm60_vm1 = vcmask 130048   ;;  %v150_v4 = vld [vmem:[#allocation5 + $0x88] sm:$0xff]  ;;  %v149_v5 = vld [vmem:[#allocation5 + $0x80] sm:$0xff]  ;;  %s554_s0 = smov [#allocation8]  }
  0x27   :  { %383 = vmatprep.subr.mxu1 %v552_v0  ;;  %415 = vmatprep.mubr.msk.f32.mxu1 %vm553_vm0, %v552_v0  ;;  %v148_v6 = vld [vmem:[#allocation5 + $0x78] sm:$0xff]  ;;  %v147_v7 = vld [vmem:[#allocation5 + $0x70] sm:$0xff]  ;;  %v146_v8 = vld [vmem:[#allocation5 + $0x68] sm:$0xff]  ;;  %s325_s2 = sshll.u32 %s554_s0, 4  ;;  %s326_s2 = int_to_ptr.vmem [resolvable:$true] %s325_s2 }
  0x28   :  { %377 = vmatpush3.msra.mxu0 %v54_v1  ;;  %384 = vmatpush3.msra.mxu1 %v150_v4  ;;  %v145_v9 = vld [vmem:[#allocation5 + $0x60] sm:$0xff]  ;;  %v144_v10 = vld [vmem:[#allocation5 + $0x58] sm:$0xff]  ;;  %v143_v11 = vld [vmem:[#allocation5 + $0x50] sm:$0xff]  ;;  %s521_s28 = scalar_lea.vmem %s326_s2, 128  ;;  %p526_p2 = scmp.lt.s32.totalorder %s326_s2, %s326_s2 }
  0x29   :  { %378 = vmatprep.subr.mxu0 %v552_v0  ;;  %385 = vmatprep.subr.mxu1 %v552_v0  ;;  %v142_v12 = vld [vmem:[#allocation5 + $0x48] sm:$0xff]  ;;  %v141_v13 = vld [vmem:[#allocation5 + $0x40] sm:$0xff]  ;;  %v140_v14 = vld [vmem:[#allocation5 + $0x38] sm:$0xff]  ;;  %p522_p1 = scmp.ne.s32.totalorder %s326_s2, %s521_s28  ;;  %p527_p3 = scmp.lt.s32.totalorder %s521_s28, %s521_s28 }
  0x2a   :  { %379 = vmatpush3.msra.mxu0 %v53_v2  ;;  %386 = vmatpush3.msra.mxu1 %v149_v5  ;;  %v139_v15 = vld [vmem:[#allocation5 + $0x30] sm:$0xff]  ;;  %v138_v16 = vld [vmem:[#allocation5 + $0x28] sm:$0xff]  ;;  %v137_v17 = vld [vmem:[#allocation5 + $0x20] sm:$0xff] }
  0x2b   :  { %381 = vmatmul.mubr.msk.f32.vlgmr.msra.gmra.mxu0 %vm60_vm1, %v52_v3  ;;  %387 = vmatprep.subr.mxu1 %v552_v0  ;;  %v136_v18 = vld [vmem:[#allocation5 + $0x18] sm:$0xff]  ;;  %v135_v19 = vld [vmem:[#allocation5 + $0x10] sm:$0xff]  ;;  %v242_v20 = vld [vmem:[#allocation5 + $0x108] sm:$0xff]  ;;  %p528_p4 = por %p527_p3, %p526_p2 }
  0x2c   :  { %418 = vmatprep.subr.mxu0 %v552_v0  ;;  %388 = vmatpush3.msra.mxu1 %v148_v6  ;;  %v241_v21 = vld [vmem:[#allocation5 + $0x100] sm:$0xff]  ;;  %v240_v22 = vld [vmem:[#allocation5 + $0xf8] sm:$0xff]  ;;  %v239_v23 = vld [vmem:[#allocation5 + $0xf0] sm:$0xff] }
  0x2d   :  { %450 = vmatprep.mubr.msk.f32.mxu0 %vm553_vm0, %v552_v0  ;;  %389 = vmatprep.subr.mxu1 %v552_v0  ;;  %v238_v24 = vld [vmem:[#allocation5 + $0xe8] sm:$0xff]  ;;  %v237_v25 = vld [vmem:[#allocation5 + $0xe0] sm:$0xff]  ;;  %v236_v26 = vld [vmem:[#allocation5 + $0xd8] sm:$0xff]  ;;  %p529_p5 = pnand %p528_p4, %p522_p1 }
  0x2e   :  { %390 = vmatpush3.msra.mxu1 %v147_v7  ;;  %419 = vmatpush3.msra.mxu0 %v242_v20  ;;  %v235_v27 = vld [vmem:[#allocation5 + $0xd0] sm:$0xff]  ;;  %v234_v28 = vld [vmem:[#allocation5 + $0xc8] sm:$0xff]  ;;  %v233_v29 = vld [vmem:[#allocation5 + $0xc0] sm:$0xff] }
  0x2f   :  { %391 = vmatprep.subr.mxu1 %v552_v0  ;;  %420 = vmatprep.subr.mxu0 %v552_v0  ;;  %v232_v30 = vld [vmem:[#allocation5 + $0xb8] sm:$0xff]  ;;  %v231_v31 = vld [vmem:[#allocation5 + $0xb0] sm:$0xff]  ;;  %v230_v32 = vld [vmem:[#allocation5 + $0xa8] sm:$0xff] }
  0x30   :  { %392 = vmatpush3.msra.mxu1 %v146_v8  ;;  %421 = vmatpush3.msra.mxu0 %v241_v21  ;;  %v335_v33 = vld [vmem:[#allocation7] ss:$0 sm:$0xff]  ;;  %v229_v38 = vld [vmem:[#allocation5 + $0xa0] sm:$0xff]  ;;  %v228_v39 = vld [vmem:[#allocation5 + $0x98] sm:$0xff] }
  0x31   :  { %393 = vmatprep.subr.mxu1 %v552_v0  ;;  %422 = vmatprep.subr.mxu0 %v552_v0  ;;  %v227_v40 = vld [vmem:[#allocation5 + $0x90] sm:$0xff] }
  0x32   :  { %394 = vmatpush3.msra.mxu1 %v145_v9  ;;  %423 = vmatpush3.msra.mxu0 %v240_v22  ;;  %v337_v41 = vld [vmem:[#allocation7 + $0x1] ss:$0 sm:$0xff]  ;;  %v338_v46 = vld [vmem:[#allocation7 + $0x2] ss:$0 sm:$0xff] }
  0x33   :  { %395 = vmatprep.subr.mxu1 %v552_v0  ;;  %424 = vmatprep.subr.mxu0 %v552_v0 }
  0x34   :  { %396 = vmatpush3.msra.mxu1 %v144_v10  ;;  %425 = vmatpush3.msra.mxu0 %v239_v23 }
  0x35   :  { %397 = vmatprep.subr.mxu1 %v552_v0  ;;  %426 = vmatprep.subr.mxu0 %v552_v0 }
  0x36   :  { %398 = vmatpush3.msra.mxu1 %v143_v11  ;;  %427 = vmatpush3.msra.mxu0 %v238_v24 }
  0x37   :  { %399 = vmatprep.subr.mxu1 %v552_v0  ;;  %428 = vmatprep.subr.mxu0 %v552_v0 }
  0x38   :  { %400 = vmatpush3.msra.mxu1 %v142_v12  ;;  %429 = vmatpush3.msra.mxu0 %v237_v25 }
  0x39   :  { %401 = vmatprep.subr.mxu1 %v552_v0  ;;  %430 = vmatprep.subr.mxu0 %v552_v0 }
  0x3a   :  { %402 = vmatpush3.msra.mxu1 %v141_v13  ;;  %431 = vmatpush3.msra.mxu0 %v236_v26 }
  0x3b   :  { %403 = vmatprep.subr.mxu1 %v552_v0  ;;  %432 = vmatprep.subr.mxu0 %v552_v0 }
  0x3c   :  { %404 = vmatpush3.msra.mxu1 %v140_v14  ;;  %433 = vmatpush3.msra.mxu0 %v235_v27 }
  0x3d   :  { %405 = vmatprep.subr.mxu1 %v552_v0  ;;  %434 = vmatprep.subr.mxu0 %v552_v0 }
  0x3e   :  { %406 = vmatpush3.msra.mxu1 %v139_v15  ;;  %435 = vmatpush3.msra.mxu0 %v234_v28 }
  0x3f   :  { %407 = vmatprep.subr.mxu1 %v552_v0  ;;  %436 = vmatprep.subr.mxu0 %v552_v0 }
  0x40   :  { %408 = vmatpush3.msra.mxu1 %v138_v16  ;;  %437 = vmatpush3.msra.mxu0 %v233_v29 }
  0x41   :  { %409 = vmatprep.subr.mxu1 %v552_v0  ;;  %438 = vmatprep.subr.mxu0 %v552_v0 }
  0x42   :  { %410 = vmatpush3.msra.mxu1 %v137_v17  ;;  %439 = vmatpush3.msra.mxu0 %v232_v30 }
  0x43   :  { %411 = vmatprep.subr.mxu1 %v552_v0  ;;  %440 = vmatprep.subr.mxu0 %v552_v0 }
  0x44   :  { %412 = vmatpush3.msra.mxu1 %v136_v18  ;;  %441 = vmatpush3.msra.mxu0 %v231_v31 }
  0x45   :  { %413 = vmatprep.subr.mxu1 %v552_v0  ;;  %442 = vmatprep.subr.mxu0 %v552_v0 }
  0x46   :  { %414 = vmatpush3.msra.mxu1 %v135_v19  ;;  %443 = vmatpush3.msra.mxu0 %v230_v32 }
  0x47   :  { %444 = vmatprep.subr.mxu0 %v552_v0 }
  0x48   :  { %445 = vmatpush3.msra.mxu0 %v229_v38 }
  0x49   :  { %446 = vmatprep.subr.mxu0 %v552_v0 }
  0x4a   :  { %447 = vmatpush3.msra.mxu0 %v228_v39 }
  0x4b   :  { %448 = vmatprep.subr.mxu0 %v552_v0 }
  0x4c   :  { %449 = vmatpush3.msra.mxu0 %v227_v40 }
  0xeb   :  { %v130_v34 = vpop.f32.mrf.mxu0 }
  0xec   :  { %v131_v35 = vadd.f32 %v335_v33, %v130_v34 }
  0xed   :  { %v382_v36 = vpop.f32.mrf.mxu0 }
  0xee   :  { %v134_v37 = vmax.f32 %v131_v35, 0.0 }
  0xf0   :  { %416 = vmatmul.mubr.f32.vlgmr.msra.gmra.mxu1 %v134_v37 }
 0x1b0   :  { %v222_v42 = vpop.f32.mrf.mxu1 }
 0x1b1   :  { %v223_v43 = vadd.f32 %v337_v41, %v222_v42 }
 0x1b2   :  { %v417_v44 = vpop.f32.mrf.mxu1 }
 0x1b3   :  { %v226_v45 = vmax.f32 %v223_v43, 0.0 }
 0x1b5   :  { %451 = vmatmul.mubr.f32.vlgmr.msra.gmra.mxu0 %v226_v45 }
 0x275   :  { %v314_v47 = vpop.f32.mrf.mxu0 }
 0x276   :  { %v315_v48 = vadd.f32 %v338_v46, %v314_v47 }
 0x277   :  { %v452_v49 = vpop.f32.mrf.mxu0 }
 0x278   :  { %318 = vst [vmem:[#allocation8] sm:$0xff] %v315_v48 }
 0x279   :  { %532 = shalt.err (!%p529_p5)
}
 0x27a   :  { %328 = dma.vmem_to_hbm [thread:$0]  %s326_s2, 128, %s630_s3, [#allocation4]  }
 0x27b   :  { %545 = dma.done.wait [#allocation4], 128  }
 0x27c   :  { %546 = vsyncadd [#allocation4], 4294967168 }
 0x27d   :  { %332 = vsyncpa [#allocation3], 1 }
 0x27e   :  { %333 = vsyncpa [#allocation6], 1 }
 0x27f   :  { %334 = vsyncpa [#allocation4], 1 }

</bundles_post_ra>
